<compile_context>
chip_gen: v7x
topology: tpu7x:2x2x1
jax: 0.10.0
libtpu: 0.0.40
codegen_flags: <defaults>
</compile_context>

<pallas_src>
import functools

import jax
import jax.numpy as jnp
from jax.experimental import pallas as pl
from jax.experimental.pallas import tpu as pltpu

LEAKY_SLOPE = 0.01          # nn.LeakyReLU default negative_slope
BN_EPS = 1e-5
LANE = 128                  # TPU lane width; internal channel dims padded to this
TL_MAX = 64                 # max output rows (L) per conv grid step
VMEM_LIMIT = 32 * 1024 * 1024


def _cpad(c):
    """Round an internal channel count up to a multiple of the lane width."""
    return max(LANE, ((c + LANE - 1) // LANE) * LANE)


def _leaky(x):
    return jnp.where(x >= 0.0, x, LEAKY_SLOPE * x)


# --------------------------------------------------------------------------
# Conv1d (+ folded BN + optional LeakyReLU) — tiled, no im2col
# --------------------------------------------------------------------------

def _conv_kernel(xc_ref, xn_ref, w_ref, b_ref, o_ref, *, K, S, act):
    """Direct conv as K accumulated shifted matmuls.

    xc_ref / xn_ref : (1, S, TL, Cin)  current / next phase-split L-blocks (bf16).
    w_ref           : (K, Cin, TCo)    BN-folded weights (bf16).
    b_ref           : (1, TCo)         folded BN bias (f32).
    o_ref           : (1, TL, TCo)     output tile (bf16).
    """
    TL = o_ref.shape[1]
    TCo = o_ref.shape[2]
    xc = xc_ref[0]                                      # (S, TL, Cin)
    xn = xn_ref[0]
    # One stride-1 slab per phase; a stride-S conv becomes K static-offset
    # matmuls over these slabs (no strided access inside the kernel).
    slabs = [jnp.concatenate([xc[p], xn[p]], axis=0) for p in range(S)]  # (2*TL, Cin)

    acc = jnp.zeros((TL, TCo), jnp.float32)
    for k in range(K):
        a = slabs[k % S][k // S:k // S + TL, :]
        acc = acc + jnp.dot(a, w_ref[k], preferred_element_type=jnp.float32)
    acc = acc + b_ref[...]
    if act:
        acc = _leaky(acc)
    o_ref[0] = acc.astype(o_ref.dtype)


def conv1d_bn_act(x, w, b, *, stride, padding, act):
    """Channels-last Conv1d(bias=False) + folded BN + optional LeakyReLU.

    x : (B, L, Cin) bf16;  w : (K, Cin, Cout) bf16;  b : (1, Cout) f32.
    Returns (B, Lout, Cout) bf16.
    """
    B, L, Cin = x.shape
    K, _, Cout = w.shape
    S = stride
    Lout = (L + 2 * padding - K) // S + 1

    TL = min(Lout, TL_MAX)
    assert Lout % TL == 0, (Lout, TL)          # demo shapes are powers of two
    assert (K - 1) // S <= TL
    nLt = Lout // TL
    TCo = min(Cout, 256)
    assert Cout % TCo == 0
    nCo = Cout // TCo

    # Phase-split the padded input: xph[b, p, j, c] = x_pad[b, S*j + p, c].
    # This is a single 1x copy of the activation (vs. the 7-15x im2col copy),
    # and lets overlapping conv windows be expressed with plain Blocked specs
    # (current block + next block).
    Lph = (nLt + 1) * TL                        # +1 trailing block for window overlap
    Lsrc = S * Lph
    xpad = jnp.pad(x, ((0, 0), (padding, Lsrc - L - padding), (0, 0)))
    xph = xpad.reshape(B, Lph, S, Cin).transpose(0, 2, 1, 3)     # (B, S, Lph, Cin)

    kern = functools.partial(_conv_kernel, K=K, S=S, act=act)
    return pl.pallas_call(
        kern,
        grid=(B, nCo, nLt),
        in_specs=[
            pl.BlockSpec((1, S, TL, Cin), lambda bi, co, lt: (bi, 0, lt, 0)),
            pl.BlockSpec((1, S, TL, Cin), lambda bi, co, lt: (bi, 0, lt + 1, 0)),
            pl.BlockSpec((K, Cin, TCo), lambda bi, co, lt: (0, 0, co)),
            pl.BlockSpec((1, TCo), lambda bi, co, lt: (0, co)),
        ],
        out_specs=pl.BlockSpec((1, TL, TCo), lambda bi, co, lt: (bi, lt, co)),
        out_shape=jax.ShapeDtypeStruct((B, Lout, Cout), jnp.bfloat16),
        compiler_params=pltpu.CompilerParams(
            dimension_semantics=("parallel", "parallel", "parallel"),
            vmem_limit_bytes=VMEM_LIMIT),
    )(xph, xph, w, b)


# --------------------------------------------------------------------------
# MaxPool1d(kernel_size=3, stride=2, padding=1) — one kernel, input read once
# --------------------------------------------------------------------------

def _maxpool3_kernel(x_ref, o_ref):
    # x_ref: (1, 2, Lout+1, C) phase-split, -inf padded; o_ref: (1, Lout, C)
    Lout = o_ref.shape[1]
    x = x_ref[0]
    even, odd = x[0], x[1]
    o_ref[0] = jnp.maximum(jnp.maximum(even[:Lout, :], odd[:Lout, :]),
                           even[1:Lout + 1, :])


def maxpool3_s2_p1(x):
    B, L, C = x.shape
    Lout = (L + 2 - 3) // 2 + 1
    Lp = 2 * (Lout + 1)
    xp = jnp.pad(x, ((0, 0), (1, Lp - L - 1), (0, 0)), constant_values=-jnp.inf)
    xph = xp.reshape(B, Lout + 1, 2, C).transpose(0, 2, 1, 3)    # (B, 2, Lout+1, C)
    return pl.pallas_call(
        _maxpool3_kernel,
        grid=(B,),
        in_specs=[pl.BlockSpec((1, 2, Lout + 1, C), lambda bi: (bi, 0, 0, 0))],
        out_specs=pl.BlockSpec((1, Lout, C), lambda bi: (bi, 0, 0)),
        out_shape=jax.ShapeDtypeStruct((B, Lout, C), x.dtype),
        compiler_params=pltpu.CompilerParams(
            dimension_semantics=("parallel",), vmem_limit_bytes=VMEM_LIMIT),
    )(xph)


# --------------------------------------------------------------------------
# Fused block tail: conv2+BN -> SE -> (+residual / downsample) -> LeakyReLU
# --------------------------------------------------------------------------

def _se_residual_core(y, w2, b2, se1, se2, residual):
    """conv2(k,p=(k-1)/2)+BN -> SE -> +residual -> LeakyReLU for one batch elem."""
    L, C = y.shape
    K = w2.shape[0]
    P = (K - 1) // 2
    zpad = jnp.zeros((P, C), y.dtype)
    slab = jnp.concatenate([zpad, y, zpad], axis=0)              # (L + K - 1, C)
    acc = jnp.zeros((L, C), jnp.float32)
    for k in range(K):
        acc = acc + jnp.dot(slab[k:k + L, :], w2[k],
                            preferred_element_type=jnp.float32)
    acc = acc + b2                                               # folded-BN bias
    # Squeeze-and-Excitation: tiny FCs stay inline (no separate pallas_call).
    m = jnp.mean(acc, axis=0, keepdims=True)                     # (1, C)
    z = jnp.maximum(jnp.dot(m, se1, preferred_element_type=jnp.float32), 0.0)
    g = jax.nn.sigmoid(jnp.dot(z, se2, preferred_element_type=jnp.float32))
    return _leaky(acc * g + residual)


def _tail_identity_kernel(y_ref, r_ref, w2_ref, b2_ref, se1_ref, se2_ref, o_ref):
    out = _se_residual_core(y_ref[0], w2_ref[...], b2_ref[...], se1_ref[...],
                            se2_ref[...], r_ref[0].astype(jnp.float32))
    o_ref[0] = out.astype(o_ref.dtype)


def _tail_downsample_kernel(y_ref, xs_ref, w2_ref, b2_ref, se1_ref, se2_ref,
                            dw_ref, db_ref, o_ref):
    # Fused 1x1 stride-s downsample conv + folded BN (xs already row-strided).
    residual = jnp.dot(xs_ref[0], dw_ref[...],
                       preferred_element_type=jnp.float32) + db_ref[...]
    out = _se_residual_core(y_ref[0], w2_ref[...], b2_ref[...], se1_ref[...],
                            se2_ref[...], residual)
    o_ref[0] = out.astype(o_ref.dtype)


def block_tail(y, res, p):
    B, L, C = y.shape
    w2, b2, se1, se2 = p['conv2_w'], p['conv2_b'], p['se_w1'], p['se_w2']
    in_specs = [
        pl.BlockSpec((1, L, C), lambda bi: (bi, 0, 0)),
        pl.BlockSpec((1,) + res.shape[1:], lambda bi: (bi, 0, 0)),
        pl.BlockSpec(w2.shape, lambda bi: (0, 0, 0)),
        pl.BlockSpec(b2.shape, lambda bi: (0, 0)),
        pl.BlockSpec(se1.shape, lambda bi: (0, 0)),
        pl.BlockSpec(se2.shape, lambda bi: (0, 0)),
    ]
    args = [y, res, w2, b2, se1, se2]
    if 'down_w' in p:
        kern = _tail_downsample_kernel
        in_specs += [pl.BlockSpec(p['down_w'].shape, lambda bi: (0, 0)),
                     pl.BlockSpec(p['down_b'].shape, lambda bi: (0, 0))]
        args += [p['down_w'], p['down_b']]
    else:
        kern = _tail_identity_kernel
    return pl.pallas_call(
        kern,
        grid=(B,),
        in_specs=in_specs,
        out_specs=pl.BlockSpec((1, L, C), lambda bi: (bi, 0, 0)),
        out_shape=jax.ShapeDtypeStruct((B, L, C), jnp.bfloat16),
        compiler_params=pltpu.CompilerParams(
            dimension_semantics=("parallel",), vmem_limit_bytes=VMEM_LIMIT),
    )(*args)


# --------------------------------------------------------------------------
# Head: adaptive avg+max pool over L, concat (as split matmuls), final FC
# --------------------------------------------------------------------------

def _head_kernel(x_ref, wa_ref, wm_ref, b_ref, o_ref):
    x = x_ref[...].astype(jnp.float32)               # (B, L, 512)
    avg = jnp.mean(x, axis=1)                        # (B, 512)
    mx = jnp.max(x, axis=1)
    o_ref[...] = (jnp.dot(avg, wa_ref[...], preferred_element_type=jnp.float32)
                  + jnp.dot(mx, wm_ref[...], preferred_element_type=jnp.float32)
                  + b_ref[...])


def head(x, wa, wm, b):
    # Deliberately gridless: the whole operand set is a few KB.
    B = x.shape[0]
    nc = b.shape[-1]
    return pl.pallas_call(
        _head_kernel,
        out_shape=jax.ShapeDtypeStruct((B, nc), jnp.float32),
    )(x, wa, wm, b)


# --------------------------------------------------------------------------
# Parameters (deterministic, synthetic): BN folded, channels-last, zero-padded
# --------------------------------------------------------------------------

def make_se_resnet_params(key, layers=(1, 1, 1, 1), num_classes=3, reduction=16):
    keys = iter(jax.random.split(key, 256))
    bn_scale = 1.0 / (1.0 + BN_EPS) ** 0.5     # BN(gamma=1,beta=0,mean=0,var=1)

    def conv_w(cout, cin, k, cout_p, cin_p):
        # kaiming_normal_(mode='fan_out', relu); BN scale folded in; stored
        # (K, Cin_p, Cout_p) channels-last, zero-padded, bf16 for the MXU.
        std = (2.0 / (cout * k)) ** 0.5
        w = std * jax.random.normal(next(keys), (k, cin, cout), jnp.float32)
        w = w * bn_scale
        wp = jnp.zeros((k, cin_p, cout_p), jnp.float32).at[:, :cin, :cout].set(w)
        return wp.astype(jnp.bfloat16)

    def bias(cout_p):
        return jnp.zeros((1, cout_p), jnp.float32)   # folded BN bias is 0 here

    def lin_w(fin, fout, fin_p=None, fout_p=None):
        fin_p = fin if fin_p is None else fin_p
        fout_p = fout if fout_p is None else fout_p
        std = 1.0 / fin ** 0.5
        w = std * jax.random.normal(next(keys), (fin, fout), jnp.float32)
        return jnp.zeros((fin_p, fout_p), jnp.float32).at[:fin, :fout].set(w)

    params = {}
    c_in = 12
    c64p = _cpad(64)
    params['conv1_w'] = conv_w(64, c_in, 15, c64p, c_in)
    params['conv1_b'] = bias(c64p)

    inplanes, inplanes_p = 64, c64p
    stages = []
    for planes, nblocks, stride in zip((64, 128, 256, 512), layers, (1, 2, 2, 2)):
        planes_p = _cpad(planes)
        blocks = []
        for bi in range(nblocks):
            s = stride if bi == 0 else 1
            r = max(planes // reduction, 1)
            p = {'stride': s}
            p['conv1_w'] = conv_w(planes, inplanes, 7, planes_p, inplanes_p)
            p['conv1_b'] = bias(planes_p)
            p['conv2_w'] = conv_w(planes, planes, 7, planes_p, planes_p)
            p['conv2_b'] = bias(planes_p)
            p['se_w1'] = lin_w(planes, r, planes_p, r)    # Linear(C, C//r).weight.T
            p['se_w2'] = lin_w(r, planes, r, planes_p)    # Linear(C//r, C).weight.T
            if s != 1 or inplanes != planes:
                dw = conv_w(planes, inplanes, 1, planes_p, inplanes_p)
                p['down_w'] = dw[0]                        # (Cin_p, Cout_p)
                p['down_b'] = bias(planes_p)
            inplanes, inplanes_p = planes, planes_p
            blocks.append(p)
        stages.append(blocks)
    params['stages'] = stages

    fc_w = lin_w(512 * 2, num_classes)                     # (1024, num_classes)
    params['fc_w_avg'] = fc_w[:512]
    params['fc_w_max'] = fc_w[512:]
    params['fc_b'] = jnp.zeros((1, num_classes), jnp.float32)
    return params


# --------------------------------------------------------------------------
# Model forward
# --------------------------------------------------------------------------

def se_block_forward(x, p):
    s = p['stride']
    y = conv1d_bn_act(x, p['conv1_w'], p['conv1_b'], stride=s, padding=3, act=True)
    if 'down_w' in p:
        # Only the strided rows the 1x1 downsample conv actually needs are
        # materialised; the conv itself is fused into the tail kernel.
        res = x[:, ::s, :]
    else:
        res = x
    return block_tail(y, res, p)


def se_resnet_forward(params, x_ncl):
    # PyTorch NCL input -> channels-last (B, L, C) bf16 for lane-dense kernels.
    x = jnp.transpose(x_ncl, (0, 2, 1)).astype(jnp.bfloat16)
    # stem: conv1(k=15,s=2,p=7) + BN(folded) + LeakyReLU
    x = conv1d_bn_act(x, params['conv1_w'], params['conv1_b'],
                      stride=2, padding=7, act=True)
    # maxpool(k=3,s=2,p=1)
    x = maxpool3_s2_p1(x)
    # layer1..layer4
    for blocks in params['stages']:
        for p in blocks:
            x = se_block_forward(x, p)
    # adaptive avg/max pool + concat + fc
    return head(x, params['fc_w_avg'], params['fc_w_max'], params['fc_b'])


# --------------------------------------------------------------------------

if __name__ == "__main__":
    key = jax.random.PRNGKey(0)
    pkey, xkey = jax.random.split(key)

    params = make_se_resnet_params(pkey, layers=(1, 1, 1, 1), num_classes=3)

    # small ECG-like input: batch=2, 12 leads, length 256 (PyTorch NCL layout)
    x = jax.random.normal(xkey, (2, 12, 256), jnp.float32)

    logits = se_resnet_forward(params, x)
    logits = jax.block_until_ready(logits)

    assert logits.shape == (2, 3), logits.shape
    assert bool(jnp.all(jnp.isfinite(logits)))
    print("KERNEL_OK")
</pallas_src>

<mosaic_0001>
module attributes {stable_mosaic.version = 11 : i64} {
  func.func @_conv_kernel(%arg0: i32, %arg1: i32, %arg2: i32, %arg3: memref<1x2x64x12xbf16, #tpu.memory_space<vmem>>, %arg4: memref<1x2x64x12xbf16, #tpu.memory_space<vmem>>, %arg5: memref<15x12x128xbf16, #tpu.memory_space<vmem>>, %arg6: memref<1x128xf32, #tpu.memory_space<vmem>>, %arg7: memref<1x64x128xbf16, #tpu.memory_space<vmem>>) attributes {dimension_semantics = [#tpu.dimension_semantics<parallel>, #tpu.dimension_semantics<parallel>, #tpu.dimension_semantics<parallel>], iteration_bounds = array<i64: 2, 1, 2>, scalar_prefetch = 0 : i64, scratch_operands = 0 : i64, tpu.core_type = #tpu.core_type<tc>, window_params = [{transform_indices = @transform_0, window_bounds = array<i64: 1, 2, 64, 12>}, {transform_indices = @transform_1, window_bounds = array<i64: 1, 2, 64, 12>}, {transform_indices = @transform_2, window_bounds = array<i64: 15, 12, 128>}, {transform_indices = @transform_3, window_bounds = array<i64: 1, 128>}, {transform_indices = @transform_4, window_bounds = array<i64: 1, 64, 128>}]} {
    %c0 = arith.constant 0 : index
    %c0_0 = arith.constant 0 : index
    %c0_1 = arith.constant 0 : index
    %c0_2 = arith.constant 0 : index
    %0 = vector.load %arg3[%c0, %c0_0, %c0_1, %c0_2] : memref<1x2x64x12xbf16, #tpu.memory_space<vmem>>, vector<1x2x64x12xbf16>
    %1 = vector.shape_cast %0 : vector<1x2x64x12xbf16> to vector<2x64x12xbf16>
    %c0_3 = arith.constant 0 : index
    %c0_4 = arith.constant 0 : index
    %c0_5 = arith.constant 0 : index
    %c0_6 = arith.constant 0 : index
    %2 = vector.load %arg4[%c0_3, %c0_4, %c0_5, %c0_6] : memref<1x2x64x12xbf16, #tpu.memory_space<vmem>>, vector<1x2x64x12xbf16>
    %3 = vector.shape_cast %2 : vector<1x2x64x12xbf16> to vector<2x64x12xbf16>
    %4 = vector.extract_strided_slice %1 {offsets = [0, 0, 0], sizes = [1, 64, 12], strides = [1, 1, 1]} : vector<2x64x12xbf16> to vector<1x64x12xbf16>
    %5 = vector.shape_cast %4 : vector<1x64x12xbf16> to vector<64x12xbf16>
    %6 = vector.extract_strided_slice %3 {offsets = [0, 0, 0], sizes = [1, 64, 12], strides = [1, 1, 1]} : vector<2x64x12xbf16> to vector<1x64x12xbf16>
    %7 = vector.shape_cast %6 : vector<1x64x12xbf16> to vector<64x12xbf16>
    %8 = tpu.concatenate %5, %7 in 0 : vector<64x12xbf16>, vector<64x12xbf16> -> vector<128x12xbf16>
    %9 = vector.extract_strided_slice %1 {offsets = [1, 0, 0], sizes = [1, 64, 12], strides = [1, 1, 1]} : vector<2x64x12xbf16> to vector<1x64x12xbf16>
    %10 = vector.shape_cast %9 : vector<1x64x12xbf16> to vector<64x12xbf16>
    %11 = vector.extract_strided_slice %3 {offsets = [1, 0, 0], sizes = [1, 64, 12], strides = [1, 1, 1]} : vector<2x64x12xbf16> to vector<1x64x12xbf16>
    %12 = vector.shape_cast %11 : vector<1x64x12xbf16> to vector<64x12xbf16>
    %13 = tpu.concatenate %10, %12 in 0 : vector<64x12xbf16>, vector<64x12xbf16> -> vector<128x12xbf16>
    %cst = arith.constant 0.000000e+00 : f32
    %14 = vector.broadcast %cst : f32 to vector<64x128xf32>
    %15 = vector.extract_strided_slice %8 {offsets = [0, 0], sizes = [64, 12], strides = [1, 1]} : vector<128x12xbf16> to vector<64x12xbf16>
    %c0_7 = arith.constant 0 : index
    %c0_8 = arith.constant 0 : index
    %c0_9 = arith.constant 0 : index
    %16 = vector.load %arg5[%c0_7, %c0_8, %c0_9] : memref<15x12x128xbf16, #tpu.memory_space<vmem>>, vector<1x12x128xbf16>
    %17 = vector.shape_cast %16 : vector<1x12x128xbf16> to vector<12x128xbf16>
    %cst_10 = arith.constant dense<0.000000e+00> : vector<64x128xf32>
    %18 = tpu.matmul %15, %17, %cst_10 {dimension_numbers = #tpu.dot_dimension_numbers<[1], [0], [0], [1], [0, 0, 1, 1], [], []>} : vector<64x12xbf16>, vector<12x128xbf16>, vector<64x128xf32> -> vector<64x128xf32>
    %19 = arith.addf %14, %18 : vector<64x128xf32>
    %20 = vector.extract_strided_slice %13 {offsets = [0, 0], sizes = [64, 12], strides = [1, 1]} : vector<128x12xbf16> to vector<64x12xbf16>
    %c1 = arith.constant 1 : index
    %c0_11 = arith.constant 0 : index
    %c0_12 = arith.constant 0 : index
    %21 = vector.load %arg5[%c1, %c0_11, %c0_12] : memref<15x12x128xbf16, #tpu.memory_space<vmem>>, vector<1x12x128xbf16>
    %22 = vector.shape_cast %21 : vector<1x12x128xbf16> to vector<12x128xbf16>
    %cst_13 = arith.constant dense<0.000000e+00> : vector<64x128xf32>
    %23 = tpu.matmul %20, %22, %cst_13 {dimension_numbers = #tpu.dot_dimension_numbers<[1], [0], [0], [1], [0, 0, 1, 1], [], []>} : vector<64x12xbf16>, vector<12x128xbf16>, vector<64x128xf32> -> vector<64x128xf32>
    %24 = arith.addf %19, %23 : vector<64x128xf32>
    %25 = vector.extract_strided_slice %8 {offsets = [1, 0], sizes = [64, 12], strides = [1, 1]} : vector<128x12xbf16> to vector<64x12xbf16>
    %c2 = arith.constant 2 : index
    %c0_14 = arith.constant 0 : index
    %c0_15 = arith.constant 0 : index
    %26 = vector.load %arg5[%c2, %c0_14, %c0_15] : memref<15x12x128xbf16, #tpu.memory_space<vmem>>, vector<1x12x128xbf16>
    %27 = vector.shape_cast %26 : vector<1x12x128xbf16> to vector<12x128xbf16>
    %cst_16 = arith.constant dense<0.000000e+00> : vector<64x128xf32>
    %28 = tpu.matmul %25, %27, %cst_16 {dimension_numbers = #tpu.dot_dimension_numbers<[1], [0], [0], [1], [0, 0, 1, 1], [], []>} : vector<64x12xbf16>, vector<12x128xbf16>, vector<64x128xf32> -> vector<64x128xf32>
    %29 = arith.addf %24, %28 : vector<64x128xf32>
    %30 = vector.extract_strided_slice %13 {offsets = [1, 0], sizes = [64, 12], strides = [1, 1]} : vector<128x12xbf16> to vector<64x12xbf16>
    %c3 = arith.constant 3 : index
    %c0_17 = arith.constant 0 : index
    %c0_18 = arith.constant 0 : index
    %31 = vector.load %arg5[%c3, %c0_17, %c0_18] : memref<15x12x128xbf16, #tpu.memory_space<vmem>>, vector<1x12x128xbf16>
    %32 = vector.shape_cast %31 : vector<1x12x128xbf16> to vector<12x128xbf16>
    %cst_19 = arith.constant dense<0.000000e+00> : vector<64x128xf32>
    %33 = tpu.matmul %30, %32, %cst_19 {dimension_numbers = #tpu.dot_dimension_numbers<[1], [0], [0], [1], [0, 0, 1, 1], [], []>} : vector<64x12xbf16>, vector<12x128xbf16>, vector<64x128xf32> -> vector<64x128xf32>
    %34 = arith.addf %29, %33 : vector<64x128xf32>
    %35 = vector.extract_strided_slice %8 {offsets = [2, 0], sizes = [64, 12], strides = [1, 1]} : vector<128x12xbf16> to vector<64x12xbf16>
    %c4 = arith.constant 4 : index
    %c0_20 = arith.constant 0 : index
    %c0_21 = arith.constant 0 : index
    %36 = vector.load %arg5[%c4, %c0_20, %c0_21] : memref<15x12x128xbf16, #tpu.memory_space<vmem>>, vector<1x12x128xbf16>
    %37 = vector.shape_cast %36 : vector<1x12x128xbf16> to vector<12x128xbf16>
    %cst_22 = arith.constant dense<0.000000e+00> : vector<64x128xf32>
    %38 = tpu.matmul %35, %37, %cst_22 {dimension_numbers = #tpu.dot_dimension_numbers<[1], [0], [0], [1], [0, 0, 1, 1], [], []>} : vector<64x12xbf16>, vector<12x128xbf16>, vector<64x128xf32> -> vector<64x128xf32>
    %39 = arith.addf %34, %38 : vector<64x128xf32>
    %40 = vector.extract_strided_slice %13 {offsets = [2, 0], sizes = [64, 12], strides = [1, 1]} : vector<128x12xbf16> to vector<64x12xbf16>
    %c5 = arith.constant 5 : index
    %c0_23 = arith.constant 0 : index
    %c0_24 = arith.constant 0 : index
    %41 = vector.load %arg5[%c5, %c0_23, %c0_24] : memref<15x12x128xbf16, #tpu.memory_space<vmem>>, vector<1x12x128xbf16>
    %42 = vector.shape_cast %41 : vector<1x12x128xbf16> to vector<12x128xbf16>
    %cst_25 = arith.constant dense<0.000000e+00> : vector<64x128xf32>
    %43 = tpu.matmul %40, %42, %cst_25 {dimension_numbers = #tpu.dot_dimension_numbers<[1], [0], [0], [1], [0, 0, 1, 1], [], []>} : vector<64x12xbf16>, vector<12x128xbf16>, vector<64x128xf32> -> vector<64x128xf32>
    %44 = arith.addf %39, %43 : vector<64x128xf32>
    %45 = vector.extract_strided_slice %8 {offsets = [3, 0], sizes = [64, 12], strides = [1, 1]} : vector<128x12xbf16> to vector<64x12xbf16>
    %c6 = arith.constant 6 : index
    %c0_26 = arith.constant 0 : index
    %c0_27 = arith.constant 0 : index
    %46 = vector.load %arg5[%c6, %c0_26, %c0_27] : memref<15x12x128xbf16, #tpu.memory_space<vmem>>, vector<1x12x128xbf16>
    %47 = vector.shape_cast %46 : vector<1x12x128xbf16> to vector<12x128xbf16>
    %cst_28 = arith.constant dense<0.000000e+00> : vector<64x128xf32>
    %48 = tpu.matmul %45, %47, %cst_28 {dimension_numbers = #tpu.dot_dimension_numbers<[1], [0], [0], [1], [0, 0, 1, 1], [], []>} : vector<64x12xbf16>, vector<12x128xbf16>, vector<64x128xf32> -> vector<64x128xf32>
    %49 = arith.addf %44, %48 : vector<64x128xf32>
    %50 = vector.extract_strided_slice %13 {offsets = [3, 0], sizes = [64, 12], strides = [1, 1]} : vector<128x12xbf16> to vector<64x12xbf16>
    %c7 = arith.constant 7 : index
    %c0_29 = arith.constant 0 : index
    %c0_30 = arith.constant 0 : index
    %51 = vector.load %arg5[%c7, %c0_29, %c0_30] : memref<15x12x128xbf16, #tpu.memory_space<vmem>>, vector<1x12x128xbf16>
    %52 = vector.shape_cast %51 : vector<1x12x128xbf16> to vector<12x128xbf16>
    %cst_31 = arith.constant dense<0.000000e+00> : vector<64x128xf32>
    %53 = tpu.matmul %50, %52, %cst_31 {dimension_numbers = #tpu.dot_dimension_numbers<[1], [0], [0], [1], [0, 0, 1, 1], [], []>} : vector<64x12xbf16>, vector<12x128xbf16>, vector<64x128xf32> -> vector<64x128xf32>
    %54 = arith.addf %49, %53 : vector<64x128xf32>
    %55 = vector.extract_strided_slice %8 {offsets = [4, 0], sizes = [64, 12], strides = [1, 1]} : vector<128x12xbf16> to vector<64x12xbf16>
    %c8 = arith.constant 8 : index
    %c0_32 = arith.constant 0 : index
    %c0_33 = arith.constant 0 : index
    %56 = vector.load %arg5[%c8, %c0_32, %c0_33] : memref<15x12x128xbf16, #tpu.memory_space<vmem>>, vector<1x12x128xbf16>
    %57 = vector.shape_cast %56 : vector<1x12x128xbf16> to vector<12x128xbf16>
    %cst_34 = arith.constant dense<0.000000e+00> : vector<64x128xf32>
    %58 = tpu.matmul %55, %57, %cst_34 {dimension_numbers = #tpu.dot_dimension_numbers<[1], [0], [0], [1], [0, 0, 1, 1], [], []>} : vector<64x12xbf16>, vector<12x128xbf16>, vector<64x128xf32> -> vector<64x128xf32>
    %59 = arith.addf %54, %58 : vector<64x128xf32>
    %60 = vector.extract_strided_slice %13 {offsets = [4, 0], sizes = [64, 12], strides = [1, 1]} : vector<128x12xbf16> to vector<64x12xbf16>
    %c9 = arith.constant 9 : index
    %c0_35 = arith.constant 0 : index
    %c0_36 = arith.constant 0 : index
    %61 = vector.load %arg5[%c9, %c0_35, %c0_36] : memref<15x12x128xbf16, #tpu.memory_space<vmem>>, vector<1x12x128xbf16>
    %62 = vector.shape_cast %61 : vector<1x12x128xbf16> to vector<12x128xbf16>
    %cst_37 = arith.constant dense<0.000000e+00> : vector<64x128xf32>
    %63 = tpu.matmul %60, %62, %cst_37 {dimension_numbers = #tpu.dot_dimension_numbers<[1], [0], [0], [1], [0, 0, 1, 1], [], []>} : vector<64x12xbf16>, vector<12x128xbf16>, vector<64x128xf32> -> vector<64x128xf32>
    %64 = arith.addf %59, %63 : vector<64x128xf32>
    %65 = vector.extract_strided_slice %8 {offsets = [5, 0], sizes = [64, 12], strides = [1, 1]} : vector<128x12xbf16> to vector<64x12xbf16>
    %c10 = arith.constant 10 : index
    %c0_38 = arith.constant 0 : index
    %c0_39 = arith.constant 0 : index
    %66 = vector.load %arg5[%c10, %c0_38, %c0_39] : memref<15x12x128xbf16, #tpu.memory_space<vmem>>, vector<1x12x128xbf16>
    %67 = vector.shape_cast %66 : vector<1x12x128xbf16> to vector<12x128xbf16>
    %cst_40 = arith.constant dense<0.000000e+00> : vector<64x128xf32>
    %68 = tpu.matmul %65, %67, %cst_40 {dimension_numbers = #tpu.dot_dimension_numbers<[1], [0], [0], [1], [0, 0, 1, 1], [], []>} : vector<64x12xbf16>, vector<12x128xbf16>, vector<64x128xf32> -> vector<64x128xf32>
    %69 = arith.addf %64, %68 : vector<64x128xf32>
    %70 = vector.extract_strided_slice %13 {offsets = [5, 0], sizes = [64, 12], strides = [1, 1]} : vector<128x12xbf16> to vector<64x12xbf16>
    %c11 = arith.constant 11 : index
    %c0_41 = arith.constant 0 : index
    %c0_42 = arith.constant 0 : index
    %71 = vector.load %arg5[%c11, %c0_41, %c0_42] : memref<15x12x128xbf16, #tpu.memory_space<vmem>>, vector<1x12x128xbf16>
    %72 = vector.shape_cast %71 : vector<1x12x128xbf16> to vector<12x128xbf16>
    %cst_43 = arith.constant dense<0.000000e+00> : vector<64x128xf32>
    %73 = tpu.matmul %70, %72, %cst_43 {dimension_numbers = #tpu.dot_dimension_numbers<[1], [0], [0], [1], [0, 0, 1, 1], [], []>} : vector<64x12xbf16>, vector<12x128xbf16>, vector<64x128xf32> -> vector<64x128xf32>
    %74 = arith.addf %69, %73 : vector<64x128xf32>
    %75 = vector.extract_strided_slice %8 {offsets = [6, 0], sizes = [64, 12], strides = [1, 1]} : vector<128x12xbf16> to vector<64x12xbf16>
    %c12 = arith.constant 12 : index
    %c0_44 = arith.constant 0 : index
    %c0_45 = arith.constant 0 : index
    %76 = vector.load %arg5[%c12, %c0_44, %c0_45] : memref<15x12x128xbf16, #tpu.memory_space<vmem>>, vector<1x12x128xbf16>
    %77 = vector.shape_cast %76 : vector<1x12x128xbf16> to vector<12x128xbf16>
    %cst_46 = arith.constant dense<0.000000e+00> : vector<64x128xf32>
    %78 = tpu.matmul %75, %77, %cst_46 {dimension_numbers = #tpu.dot_dimension_numbers<[1], [0], [0], [1], [0, 0, 1, 1], [], []>} : vector<64x12xbf16>, vector<12x128xbf16>, vector<64x128xf32> -> vector<64x128xf32>
    %79 = arith.addf %74, %78 : vector<64x128xf32>
    %80 = vector.extract_strided_slice %13 {offsets = [6, 0], sizes = [64, 12], strides = [1, 1]} : vector<128x12xbf16> to vector<64x12xbf16>
    %c13 = arith.constant 13 : index
    %c0_47 = arith.constant 0 : index
    %c0_48 = arith.constant 0 : index
    %81 = vector.load %arg5[%c13, %c0_47, %c0_48] : memref<15x12x128xbf16, #tpu.memory_space<vmem>>, vector<1x12x128xbf16>
    %82 = vector.shape_cast %81 : vector<1x12x128xbf16> to vector<12x128xbf16>
    %cst_49 = arith.constant dense<0.000000e+00> : vector<64x128xf32>
    %83 = tpu.matmul %80, %82, %cst_49 {dimension_numbers = #tpu.dot_dimension_numbers<[1], [0], [0], [1], [0, 0, 1, 1], [], []>} : vector<64x12xbf16>, vector<12x128xbf16>, vector<64x128xf32> -> vector<64x128xf32>
    %84 = arith.addf %79, %83 : vector<64x128xf32>
    %85 = vector.extract_strided_slice %8 {offsets = [7, 0], sizes = [64, 12], strides = [1, 1]} : vector<128x12xbf16> to vector<64x12xbf16>
    %c14 = arith.constant 14 : index
    %c0_50 = arith.constant 0 : index
    %c0_51 = arith.constant 0 : index
    %86 = vector.load %arg5[%c14, %c0_50, %c0_51] : memref<15x12x128xbf16, #tpu.memory_space<vmem>>, vector<1x12x128xbf16>
    %87 = vector.shape_cast %86 : vector<1x12x128xbf16> to vector<12x128xbf16>
    %cst_52 = arith.constant dense<0.000000e+00> : vector<64x128xf32>
    %88 = tpu.matmul %85, %87, %cst_52 {dimension_numbers = #tpu.dot_dimension_numbers<[1], [0], [0], [1], [0, 0, 1, 1], [], []>} : vector<64x12xbf16>, vector<12x128xbf16>, vector<64x128xf32> -> vector<64x128xf32>
    %89 = arith.addf %84, %88 : vector<64x128xf32>
    %c0_53 = arith.constant 0 : index
    %c0_54 = arith.constant 0 : index
    %90 = vector.load %arg6[%c0_53, %c0_54] : memref<1x128xf32, #tpu.memory_space<vmem>>, vector<1x128xf32>
    %91 = vector.broadcast %90 : vector<1x128xf32> to vector<64x128xf32>
    %92 = arith.addf %89, %91 : vector<64x128xf32>
    %cst_55 = arith.constant 0.000000e+00 : f32
    %93 = vector.broadcast %cst_55 : f32 to vector<64x128xf32>
    %94 = arith.cmpf oge, %92, %93 : vector<64x128xf32>
    %cst_56 = arith.constant 0.00999999977 : f32
    %95 = vector.broadcast %cst_56 : f32 to vector<64x128xf32>
    %96 = arith.mulf %95, %92 : vector<64x128xf32>
    %97 = arith.select %94, %92, %96 : vector<64x128xi1>, vector<64x128xf32>
    %98 = arith.truncf %97 : vector<64x128xf32> to vector<64x128xbf16>
    %c0_57 = arith.constant 0 : index
    %c0_58 = arith.constant 0 : index
    %c0_59 = arith.constant 0 : index
    %99 = vector.load %arg7[%c0_57, %c0_58, %c0_59] : memref<1x64x128xbf16, #tpu.memory_space<vmem>>, vector<1x64x128xbf16>
    %100 = vector.shape_cast %99 : vector<1x64x128xbf16> to vector<64x128xbf16>
    %101 = vector.shape_cast %98 : vector<64x128xbf16> to vector<1x64x128xbf16>
    tpu.vector_store %arg7[%c0_57, %c0_58, %c0_59], %101 {strides = array<i32>} : memref<1x64x128xbf16, #tpu.memory_space<vmem>>, vector<1x64x128xbf16>,
    return
  }
  func.func @transform_0(%arg0: i32, %arg1: i32, %arg2: i32) -> (i32, i32, i32, i32) {
    %c0_i32 = arith.constant 0 : i32
    %c0_i32_0 = arith.constant 0 : i32
    %c0_i32_1 = arith.constant 0 : i32
    return %arg0, %c0_i32, %arg2, %c0_i32_0 : i32, i32, i32, i32
  }
  func.func @transform_1(%arg0: i32, %arg1: i32, %arg2: i32) -> (i32, i32, i32, i32) {
    %c1_i32 = arith.constant 1 : i32
    %0 = arith.addi %arg2, %c1_i32 : i32
    %c0_i32 = arith.constant 0 : i32
    %c0_i32_0 = arith.constant 0 : i32
    %c0_i32_1 = arith.constant 0 : i32
    return %arg0, %c0_i32, %0, %c0_i32_0 : i32, i32, i32, i32
  }
  func.func @transform_2(%arg0: i32, %arg1: i32, %arg2: i32) -> (i32, i32, i32) {
    %c0_i32 = arith.constant 0 : i32
    %c0_i32_0 = arith.constant 0 : i32
    %c0_i32_1 = arith.constant 0 : i32
    return %c0_i32, %c0_i32_0, %arg1 : i32, i32, i32
  }
  func.func @transform_3(%arg0: i32, %arg1: i32, %arg2: i32) -> (i32, i32) {
    %c0_i32 = arith.constant 0 : i32
    %c0_i32_0 = arith.constant 0 : i32
    return %c0_i32, %arg1 : i32, i32
  }
  func.func @transform_4(%arg0: i32, %arg1: i32, %arg2: i32) -> (i32, i32, i32) {
    %c0_i32 = arith.constant 0 : i32
    return %arg0, %arg2, %arg1 : i32, i32, i32
  }
}

</mosaic_0001>

<bundles_post_ra>
// kernel: tpu_custom_call.1
= control target key start
LH: loop header
LB: loop body
LE: loop exit
PB: predicated region body
PF: predicated region fallthrough
CT: control target
= control target key end

     0   :  { %9 = vsyncpa [#allocation5], 0  ;;  %s3943_s0 = inlined_call_operand.vmem [shape: bf16[2,2,192,12], index: 0, kind: input, shape index: {}]   ;;  %s3944_s1 = inlined_call_operand.vmem [shape: bf16[2,2,192,12], index: 1, kind: input, shape index: {}]   ;;  %s3945_s2 = inlined_call_operand.vmem [shape: bf16[15,12,128], index: 2, kind: input, shape index: {}]   ;;  %s3946_s3 = inlined_call_operand.vmem [shape: f32[1,128], index: 3, kind: input, shape index: {}]   ;;  %s3947_s4 = inlined_call_operand.hbm [shape: bf16[2,128,128], index: 4, kind: output, shape index: {}]  }
   0x1   :  { %11 = vsyncpa [#allocation5 + $0x1], 0  ;;  %s3244_s15 = smov 0   ;;  %s3246_s16 = smov 0  }
   0x2   :  { %s3248_s17 = smov 0   ;;  %s3250_s18 = smov 0  }
   0x3   :  { %s3252_s19 = smov 0   ;;  %s3254_s20 = smov 0  }
   0x4   :  { %s3256_s21 = smov 0   ;;  %s3258_s22 = smov 0  }
   0x5   :  { %s3260_s23 = smov 0   ;;  %s3262_s24 = smov 0  }
   0x6 LB: > { %s2443_s25 = sadd.s32 4294967295, %s3214_s24   ;;  %s2444_s26 = sadd.s32 4294967294, %s3214_s24   ;;  %s3214_s24 = sphi %s3262_s24, %s17_s24   ;;  %s3210_s23 = sphi %s3260_s23, %s3975_s23   ;;  %s3206_s22 = sphi %s3258_s22, %s3974_s22   ;;  %s3202_s21 = sphi %s3256_s21, %s3973_s21   ;;  %s3198_s20 = sphi %s3254_s20, %s3972_s20   ;;  %s3194_s19 = sphi %s3252_s19, %s3971_s19   ;;  %s3190_s18 = sphi %s3250_s18, %s3970_s18   ;;  %s3186_s17 = sphi %s3248_s17, %s3969_s17   ;;  %s3182_s16 = sphi %s3246_s16, %s3968_s16   ;;  %s3178_s15 = sphi %s3244_s15, %s3967_s15  }
   0x7   : > { %s29_s27 = sadd.s32 1, %s3206_s22  ;;  %s36_s28 = sadd.s32 1, %s3210_s23 }
   0x8   : > { %p30_p0 = scmp.ge.s32.totalorder %s29_s27, 2  ;;  %s45_s29 = sadd.s32 1, %s3194_s19 }
   0x9   : > { %p52_p1 = scmp.ne.s32.totalorder %s3194_s19, %s3190_s18  ;;  %p53_p2 = scmp.eq.s32.totalorder %s3214_s24, 0 }
   0xa   : > { %s3302_s30 = scalar_select %p30_p0, 0, %s29_s27  }
   0xb   : > { %s3977_s28 = smov (!%p30_p0, %s36_s28), %s3210_s23  ;;  %p3312_p3 = por %p53_p2, %p52_p1 }
   0xc   : > { %3952 = sst [smem:[#allocation7_spill]] %s3302_s30  ;;  %s41_s5 = ssub.s32 %s3206_s22, %s3302_s30 }
   0xd   : > { %p38_p4 = scmp.ge.s32.totalorder %s3977_s28, 2  ;;  %s69_s7 = sadd.s32 1, %s3302_s30 }
   0xe   : > { %s71_s8 = ssub.s32 %s29_s27, %s69_s7  ;;  %s75_s9 = sadd.s32 1, %s3186_s17 }
   0xf   : > { %s3979_s28 = smov (%p38_p4, %s3977_s28), 0  ;;  %p82_p5 = scmp.ne.s32.totalorder %s3186_s17, %s3182_s16 }
  0x10   : > { %3954 = sst [smem:[#allocation8_spill]] %s3979_s28  ;;  %p168_p6 = scmp.eq.s32.totalorder %s2443_s25, 3 }
  0x11   : > { %s40_s10 = ssub.s32 %s3210_s23, %s3979_s28  ;;  %p173_p7 = scmp.ne.s32.totalorder %s3190_s18, %s3178_s15 }
  0x12   : > { %s42_s11 = sor.u32 %s41_s5, %s40_s10  ;;  %s72_s12 = sor.u32 %s71_s8, %s40_s10 }
  0x13   : > { %p43_p8 = scmp.eq.s32.totalorder %s42_s11, 0  ;;  %p73_p9 = scmp.eq.s32.totalorder %s72_s12, 0 }
  0x14   : > { %p3328_p10 = por %p82_p5, %p53_p2  ;;  %p3335_p11 = por %p168_p6, %p52_p1 }
  0x15   : > { %s3340_s27 = scalar_select %p43_p8, %s3194_s19, %s45_s29  }
  0x16   : > { %s3343_s7 = scalar_select %p73_p9, %s3186_s17, %s75_s9  }
  0x17   : > { %p174_p12 = scmp.eq.s32.totalorder %s2444_s26, 3  ;;  %p2448_p0 = scmp.ge.s32.totalorder %s3214_s24, 4 }
  0x19   : > { %p3345_p13 = por %p174_p12, %p173_p7  ;;  %203 = sbr.rel (%p2448_p0) target bundleno = 56 (0x38), region = 24 }
  0x20   : > { %206 = sbr.rel (!%p3312_p3) target bundleno = 44 (0x2c), region = 28  ;;  %s208_s5 = sand.u32 (%p3312_p3), 1, %s3194_s19  }
  0x21   : > { %s2450_s8 = sshll.u32 (%p3312_p3), %s3206_s22, 3  ;;  %s2449_s29 = sshll.u32 (%p3312_p3), %s208_s5, 6 }
  0x22   : > { %s2989_s10 = smul.u32 (%p3312_p3), 48, %s3210_s23  ;;  %s210_s30 = scalar_lea.vmem (%p3312_p3), [#allocation2], %s2449_s29 }
  0x24   : > { %s213_s9 = sadd.s32 (%p3312_p3), %s2989_s10, %s2450_s8 }
  0x25   : > { %s2451_s11 = sshll.u32 (%p3312_p3), %s213_s9, 2 }
  0x26   : > { %s215_s28 = scalar_lea.vmem (%p3312_p3), %s3943_s0, %s2451_s11 }
  0x27   : > { %v231_v0 = vld [vmem:[%s215_s28] sm:$0xff]   ;;  %v235_v1 = vld [vmem:[%s215_s28 + $0x8] sm:$0xff]   ;;  %v239_v2 = vld [vmem:[%s215_s28 + $0x10] sm:$0xff]  }
  0x28   : > { %232 = vst [vmem:[%s210_s30] sm:$0xff] %v231_v0   ;;  %236 = vst [vmem:[%s210_s30 + $0x8] sm:$0xff] %v235_v1   ;;  %v243_v3 = vld [vmem:[%s215_s28 + $0x18] sm:$0xff]   ;;  %v247_v4 = vld [vmem:[%s215_s28 + $0x60] sm:$0xff]  }
  0x29   : > { %240 = vst [vmem:[%s210_s30 + $0x10] sm:$0xff] %v239_v2   ;;  %v251_v5 = vld [vmem:[%s215_s28 + $0x68] sm:$0xff]   ;;  %244 = vst [vmem:[%s210_s30 + $0x18] sm:$0xff] %v243_v3   ;;  %v255_v6 = vld [vmem:[%s215_s28 + $0x70] sm:$0xff]  }
  0x2a   : > { %248 = vst [vmem:[%s210_s30 + $0x20] sm:$0xff] %v247_v4   ;;  %252 = vst [vmem:[%s210_s30 + $0x28] sm:$0xff] %v251_v5   ;;  %v259_v7 = vld [vmem:[%s215_s28 + $0x78] sm:$0xff]  }
  0x2b   : > { %256 = vst [vmem:[%s210_s30 + $0x30] sm:$0xff] %v255_v6   ;;  %260 = vst [vmem:[%s210_s30 + $0x38] sm:$0xff] %v259_v7  }
  0x2c PF: > { %317 = sbr.rel (!%p3328_p10) target bundleno = 56 (0x38), region = 69  ;;  %s319_s6 = sand.u32 (%p3328_p10), 1, %s3186_s17  }
  0x2d   : > { %s2453_s5 = sshll.u32 (%p3328_p10), %s3206_s22, 3  ;;  %s2452_s8 = sshll.u32 (%p3328_p10), %s319_s6, 6 }
  0x2e   : > { %s2342_s29 = smul.u32 (%p3328_p10), 48, %s3210_s23  ;;  %s321_s28 = scalar_lea.vmem (%p3328_p10), [#allocation3], %s2452_s8 }
  0x30   : > { %s2343_s10 = sadd.s32 (%p3328_p10), %s2453_s5, %s2342_s29 }
  0x31   : > { %s2454_s9 = sshll.u32 (%p3328_p10), %s2343_s10, 2 }
  0x32   : > { %s2345_s12 = scalar_lea.vmem (%p3328_p10), %s3944_s1, %s2454_s9 }
  0x33   : > { %v2455_v8 = vld [vmem:[%s2345_s12 + $0x20] sm:$0xff]   ;;  %v2457_v9 = vld [vmem:[%s2345_s12 + $0x28] sm:$0xff]   ;;  %v2459_v10 = vld [vmem:[%s2345_s12 + $0x30] sm:$0xff]  }
  0x34   : > { %344 = vst [vmem:[%s321_s28] sm:$0xff] %v2455_v8   ;;  %348 = vst [vmem:[%s321_s28 + $0x8] sm:$0xff] %v2457_v9   ;;  %v2461_v11 = vld [vmem:[%s2345_s12 + $0x38] sm:$0xff]   ;;  %v2463_v12 = vld [vmem:[%s2345_s12 + $0x80] sm:$0xff]  }
  0x35   : > { %352 = vst [vmem:[%s321_s28 + $0x10] sm:$0xff] %v2459_v10   ;;  %v2465_v13 = vld [vmem:[%s2345_s12 + $0x88] sm:$0xff]   ;;  %356 = vst [vmem:[%s321_s28 + $0x18] sm:$0xff] %v2461_v11   ;;  %v2467_v14 = vld [vmem:[%s2345_s12 + $0x90] sm:$0xff]  }
  0x36   : > { %360 = vst [vmem:[%s321_s28 + $0x20] sm:$0xff] %v2463_v12   ;;  %364 = vst [vmem:[%s321_s28 + $0x28] sm:$0xff] %v2465_v13   ;;  %v2469_v15 = vld [vmem:[%s2345_s12 + $0x98] sm:$0xff]  }
  0x37   : > { %368 = vst [vmem:[%s321_s28 + $0x30] sm:$0xff] %v2467_v14   ;;  %372 = vst [vmem:[%s321_s28 + $0x38] sm:$0xff] %v2469_v15  }
  0x38 PF: > { %p2471_p1 = scmp.ge.s32.totalorder %s3214_s24, 1  ;;  %p428_p2 = scmp.lt.s32.totalorder %s3214_s24, 5 }
  0x3a   : > { %p429_p3 = pnand %p2471_p1, %p428_p2 }
  0x3c   : > { %432 = sbr.rel (%p429_p3) target bundleno = 434 (0x1b2), region = 110 }
  0x43   : > { %v3079_v16 = vld [vmem:[%s3945_s2 + $0x8] sm:$0x3f]   ;;  %vm583_vm0 = vcmask 1045504   ;;  %s3372_s6 = sand.u32 1, %s3190_s18   ;;  %v3380_v18 = vld [vmem:[%s3945_s2 + $0x38] sm:$0x3f]  }
  0x44   : > { %2973 = vmatprep.subr.msk.bf16.mxu1 %vm583_vm0, %v3079_v16  ;;  %v585_v17 = vsel %vm583_vm0, %v3079_v16, 0  ;;  %s2472_s5 = sshll.u32 %s3372_s6, 6  ;;  %vm570_vm1 = vcmask 97280   ;;  %2980 = vmatprep.subr.msk.bf16.mxu0 %vm583_vm0, %v3380_v18  ;;  %v3391_v20 = vsel %vm583_vm0, %v3380_v18, 0  ;;  %s442_s9 = sand.u32 1, %s3182_s16   ;;  %vm997_vm5 = vcmask 1046528  }
  0x45   : > { %2710 = vmatpush3.bf16.msra.mxu1 %v585_v17  ;;  %s3382_s10 = scalar_lea.vmem [#allocation2], %s2472_s5  ;;  %3958 = vst [vmem:[#allocation9_spill] sm:$0xff] %v3391_v20  ;;  %2780 = vmatpush3.bf16.msra.mxu0 %v3391_v20  ;;  %v3083_v22 = vld [vmem:[%s3945_s2] sm:$0x3f]   ;;  %vm1208_vm2 = vsmask.f32 6400 }
  0x46   : > { %v3385_v19 = vld [vmem:[%s3382_s10 + $0x20] sm:$0xff]   ;;  %v3394_v21 = vld [vmem:[%s3382_s10 + $0x28] sm:$0xff]   ;;  %2974 = vmatprep.subr.msk.bf16.mxu1 %vm583_vm0, %v3083_v22  ;;  %v3426_v32 = vld [vmem:[%s3382_s10 + $0x30] sm:$0xff]   ;;  %v670_v33 = vsel %vm583_vm0, %v3083_v22, 0  ;;  %s3433_s28 = sshll.u32 %s442_s9, 6  ;;  %vm1885_vm6 = vcmask 1044480  }
  0x47   : > { %2711 = vmatprep.mubr.msk.bf16.mxu1 %vm570_vm1, %v3385_v19  ;;  %v3404_v23 = vshrl.u32 %v3385_v19, 16  ;;  %v3407_v24 = vshll.u32 %v3385_v19, 16  ;;  %v3412_v25 = vshll.u32 %v3394_v21, 16  ;;  %v3415_v26 = vshrl.u32 %v3394_v21, 16  ;;  %v3084_v29 = vld [vmem:[%s3945_s2 + $0x40] sm:$0x3f]  }
  0x48   : > { %2712 = vmatmul.mubr.msk.bf16.vlgmr.msra.gmra.mrb[0].mxu1 %vm570_vm1, %v3394_v21  ;;  %2982 = vmatprep.subr.msk.bf16.mxu0 %vm583_vm0, %v3084_v29  ;;  %v3431_v35 = vld [vmem:[%s3382_s10 + $0x38] sm:$0xff]   ;;  %v3438_v37 = vshll.u32 %v3426_v32, 16  ;;  %v3441_v38 = vshrl.u32 %v3426_v32, 16  ;;  %v3444_v39 = vld [vmem:[%s3382_s10] sm:$0xff]   ;;  %v3450_v43 = vld [vmem:[%s3382_s10 + $0x8] sm:$0xff]   ;;  %v1471_v46 = vsel %vm583_vm0, %v3084_v29, 0 }
  0x49   : > { %v1326_v27 = vrot.slane %v3404_v23, 1  ;;  %v1327_v28 = vrot.slane %v3407_v24, 2  ;;  %v1329_v30 = vrot.slane %v3415_v26, 1  ;;  %v1330_v31 = vrot.slane %v3412_v25, 2  ;;  %2720 = vmatpush3.bf16.msra.mxu1 %v670_v33  ;;  %2715 = vmatprep.mubr.msk.bf16.mxu1 %vm570_vm1, %v3426_v32  ;;  %v3089_v48 = vld [vmem:[%s3945_s2 + $0x48] sm:$0x3f]  }
  0x4a   : > { %v1333_v41 = vrot.slane %v3441_v38, 1  ;;  %v1334_v42 = vrot.slane %v3438_v37, 2  ;;  %v1444_v44 = vrot.slane %v3444_v39, 2  ;;  %v1445_v47 = vrot.slane %v3450_v43, 2  ;;  %v3091_v51 = vld [vmem:[%s3945_s2 + $0x10] sm:$0x3f]  }
  0x4b   : > { %v1328_v34 = vor.u32 %v1327_v28, %v1326_v27  ;;  %v1331_v36 = vor.u32 %v1330_v31, %v1329_v30  ;;  %s444_s29 = scalar_lea.vmem [#allocation3], %s3433_s28  ;;  %v3475_v52 = vld [vmem:[%s3382_s10 + $0x10] sm:$0xff]   ;;  %v3478_v53 = vshll.u32 %v3444_v39, 16  ;;  %2975 = vmatprep.subr.msk.bf16.mxu1 %vm583_vm0, %v3091_v51  ;;  %v3483_v54 = vld [vmem:[%s3382_s10 + $0x18] sm:$0xff]   ;;  %v791_v55 = vsel %vm583_vm0, %v3091_v51, 0  ;;  %s2474_s13 = sshll.u32 %s3372_s6, 5 }
  0x4c   : > { %v3454_v45 = vor.u32 %v1334_v42, %v1333_v41  ;;  %v1446_v50 = vsel %vm583_vm0, %v1444_v44, %v1445_v47  ;;  %v3487_v56 = vshrl.u32 %v3444_v39, 16  ;;  %v3491_v58 = vshll.u32 %v3450_v43, 16  ;;  %v3498_v60 = vld [vmem:[%s444_s29] sm:$0xff]   ;;  %v3095_v61 = vld [vmem:[%s3945_s2 + $0x18] sm:$0x3f]   ;;  %s2598_s5 = sshll.u32 %s3198_s20, 3 }
  0x4d   : > { %v1332_v40 = vsel %vm1208_vm2, %v1328_v34, %v1331_v36  ;;  %v745_v57 = vrot.slane %v3478_v53, 1  ;;  %v1447_v59 = vrot.slane %v3475_v52, 2  ;;  %v1449_v62 = vrot.slane %v3483_v54, 2  ;;  %v3094_v8 = vld [vmem:[%s3945_s2 + $0x50] sm:$0x3f]   ;;  %v3546_v27 = vld [vmem:[%s444_s29 + $0x20] sm:$0xff]  }
  0x4e   : > { %2781 = vmatprep.mubr.msk.bf16.mxu0 %vm570_vm1, %v1332_v40  ;;  %v1336_v49 = vsel %vm1208_vm2, %v1331_v36, %v3454_v45  ;;  %v749_v0 = vrot.slane %v3491_v58, 1  ;;  %vm740_vm3 = vsmask.f32 7424  ;;  %v3510_v1 = vshrl.u32 %v3450_v43, 16  ;;  %s2599_s8 = sshll.u32 %s3202_s21, 4  ;;  %s477_s29 = scalar_lea.vmem [#allocation4], %s2474_s13 }
  0x4f   : > { %2782 = vmatmul.mubr.msk.bf16.vlgmr.msra.gmra.mrb[0].mxu0 %vm570_vm1, %v1336_v49  ;;  %v746_v63 = vor.u32 %v745_v57, %v3487_v56  ;;  %v3513_v2 = vshll.u32 %v3475_v52, 16  ;;  %v1549_v3 = vrot.slane %v3385_v19, 2  ;;  %v1448_v4 = vsel %vm583_vm0, %v1445_v47, %v1447_v59  ;;  %v3098_v57 = vld [vmem:[%s3945_s2 + $0x20] sm:$0x3f]   ;;  %s2302_s10 = sadd.s32 %s2599_s8, %s2598_s5  ;;  %s2305_s21 = sshll.u32 %s477_s29, 4  ;;  %s3883_s21 = int_to_ptr.vmem [resolvable:$true] %s2305_s21 }
  0x50   : > { %2716 = vmatmul.mubr.msk.bf16.gmra.mrb[4].mxu1 %vm570_vm1, %v3431_v35  ;;  %2790 = vmatpush3.bf16.msra.mxu0 %v1471_v46  ;;  %v1576_v5 = vsel %vm583_vm0, %v3089_v48, 0  ;;  %v1451_v6 = vrot.slane %v3498_v60, 2  ;;  %v1550_v7 = vrot.slane %v3394_v21, 2  ;;  %v1450_v9 = vsel %vm583_vm0, %v1447_v59, %v1449_v62  ;;  %s2600_s20 = sshll.u32 %s2302_s10, 6  ;;  %s2289_s16 = scalar_lea.sflag [#allocation5], %s3372_s6 }
  0x51   : > { %2721 = vmatprep.mubr.msk.bf16.mxu1 %vm570_vm1, %v3444_v39  ;;  %2791 = vmatprep.mubr.msk.bf16.mxu0 %vm570_vm1, %v1446_v50  ;;  %v750_v10 = vsel %vm740_vm3, %v746_v63, %v749_v0  ;;  %v3526_v11 = vshrl.u32 %v3475_v52, 16  ;;  %v3529_v12 = vshll.u32 %v3483_v54, 16  ;;  %v753_v13 = vor.u32 %v3510_v1, %v749_v0  ;;  %s3881_s26 = scalar_lea.hbm %s3947_s4, %s2600_s20  ;;  %s3104_s12 = scalar_lea.vmem %s3883_s21, 512 }
  0x52   : > { %2983 = vmatprep.subr.msk.bf16.mxu0 %vm583_vm0, %v3089_v48  ;;  %v756_v14 = vrot.slane %v3513_v2, 1  ;;  %v1452_v15 = vsel %vm583_vm0, %v1449_v62, %v1451_v6  ;;  %v1551_v16 = vsel %vm583_vm0, %v1549_v3, %v1550_v7  ;;  %v1552_v17 = vrot.slane %v3426_v32, 2  ;;  %v3097_v3 = vld [vmem:[%s3945_s2 + $0x58] sm:$0x3f]   ;;  %p3105_p4 = scmp.ne.s32.totalorder %s3883_s21, %s3104_s12  ;;  %s3216_s28 = smov [#allocation4]  }
  0x53   : > { %v3542_v22 = vsel %vm583_vm0, %v3094_v8, 0  ;;  %v763_v29 = vrot.slane %v3529_v12, 1  ;;  %v3552_v30 = vshrl.u32 %v3483_v54, 16  ;;  %v3555_v31 = vshll.u32 %v3498_v60, 16  ;;  %s3108_s30 = sshll.u32 %s3216_s28, 4  ;;  %s3109_s30 = int_to_ptr.vmem [resolvable:$false] %s3108_s30 }
  0x54   : > { %v760_v28 = vor.u32 %v3526_v11, %v756_v14  ;;  %v757_v33 = vsel %vm740_vm3, %v753_v13, %v756_v14  ;;  %v919_v34 = vsel %vm583_vm0, %v3095_v61, 0  ;;  %v873_v36 = vrot.slane %v3407_v24, 1  ;;  %p3106_p5 = pnand %p3105_p4, %p3335_p11  ;;  %s3110_s13 = scalar_lea.vmem %s3109_s30, 1024 }
  0x55   : > { %v877_v40 = vrot.slane %v3412_v25, 1  ;;  %v1655_v41 = vrot.slane %v3487_v56, 2  ;;  %v1656_v42 = vrot.slane %v3478_v53, 3  ;;  %v1658_v44 = vrot.slane %v3510_v1, 2  ;;  %p3111_p7 = scmp.lt.s32.totalorder %s3883_s21, %s3109_s30  ;;  %p3112_p8 = scmp.lt.s32.totalorder %s3110_s13, %s3104_s12 }
  0x56   : > { %v1659_v46 = vrot.slane %v3491_v58, 3  ;;  %v1554_v47 = vrot.slane %v3431_v35, 2  ;;  %v1556_v48 = vrot.slane %v3546_v27, 2  ;;  %v1662_v49 = vrot.slane %v3526_v11, 2  ;;  %p3107_p6 = pneg %p3106_p5 }
  0x57   : > { %v1663_v50 = vrot.slane %v3513_v2, 3  ;;  %v764_v51 = vsel %vm740_vm3, %v760_v28, %v763_v29  ;;  %v3575_v59 = vshll.u32 %v3431_v35, 16  ;;  %v874_v62 = vor.u32 %v873_v36, %v3404_v23  ;;  %p3113_p9 = por %p3112_p8, %p3111_p7 }
  0x58   : > { %2722 = vmatmul.mubr.msk.bf16.vlgmr.msra.gmra.mrb[0].mxu1 %vm570_vm1, %v3450_v43  ;;  %v881_v63 = vor.u32 %v3415_v26, %v877_v40  ;;  %v884_v0 = vrot.slane %v3438_v37, 1  ;;  %vm1654_vm4 = vsmask.f32 5376  ;;  %v1660_v6 = vor.u32 %v1659_v46, %v1658_v44 }
  0x59   : > { %2725 = vmatprep.mubr.msk.bf16.mxu1 %vm570_vm1, %v3475_v52  ;;  %2730 = vmatpush3.bf16.msra.mxu1 %v791_v55  ;;  %v771_v55 = vrot.slane %v3555_v31, 1  ;;  %v3594_v13 = vshll.u32 %v3546_v27, 16  ;;  %v891_v14 = vrot.slane %v3575_v59, 1  ;;  %v878_v28 = vsel %vm740_vm3, %v874_v62, %v877_v40  ;;  %p3114_p10 = pnand %p3113_p9, %p3107_p6 }
  0x5a   : > { %2976 = vmatprep.subr.msk.bf16.mxu1 %vm583_vm0, %v3095_v61  ;;  %v767_v61 = vor.u32 %v3552_v30, %v763_v29  ;;  %v885_v29 = vsel %vm740_vm3, %v881_v63, %v884_v0  ;;  %v888_v36 = vor.u32 %v3441_v38, %v884_v0  ;;  %v1671_v40 = vrot.slane %v3555_v31, 3 }
  0x5b   : > { %2792 = vmatmul.mubr.msk.bf16.vlgmr.msra.gmra.mrb[0].mxu0 %vm570_vm1, %v1448_v4  ;;  %v1553_v4 = vsel %vm583_vm0, %v1550_v7, %v1552_v17  ;;  %v3599_v7 = vshrl.u32 %v3431_v35, 16  ;;  %v899_v46 = vrot.slane %v3594_v13, 1  ;;  %v1889_v0 = vrot.slane %v3475_v52, 3 }
  0x5c   : > { %2800 = vmatpush3.bf16.msra.mxu0 %v1576_v5  ;;  %2795 = vmatprep.mubr.msk.bf16.mxu0 %vm570_vm1, %v1450_v9  ;;  %v1657_v5 = vor.u32 %v1656_v42, %v1655_v41  ;;  %v3591_v9 = vsel %vm583_vm0, %v1554_v47, %v1556_v48  ;;  %v1025_v41 = vsel %vm583_vm0, %v3098_v57, 0  ;;  %v3613_v42 = vshrl.u32 %v3498_v60, 16 }
  0x5d   : > { %2984 = vmatprep.subr.msk.bf16.mxu0 %vm583_vm0, %v3094_v8  ;;  %v1555_v8 = vsel %vm583_vm0, %v1552_v17, %v1554_v47  ;;  %v772_v17 = vsel %vm740_vm3, %v767_v61, %v771_v55  ;;  %v1103_v47 = vrot.slane %v3385_v19, 1  ;;  %v895_v48 = vor.u32 %v3599_v7, %v891_v14 }
  0x5e   : > { %v1886_v55 = vrot.slane %v3444_v39, 3  ;;  %v892_v61 = vsel %vm740_vm3, %v888_v36, %v891_v14  ;;  %v1670_v62 = vrot.slane %v3613_v42, 2  ;;  %v1770_v36 = vrot.slane %v3404_v23, 2  ;;  %v3682_v23 = vld [vmem:[%s3945_s2 + $0x28] sm:$0x3f]  }
  0x5f   : > { %v3649_v14 = vsel %vm740_vm3, %v895_v48, %v899_v46  ;;  %v1212_v46 = vrot.slane %v3510_v1, 1  ;;  %v1992_v20 = vrot.slane %v3394_v21, 3  ;;  %vm2096_vm7 = vsmask.f32 4352 }
  0x60   : > { %2726 = vmatmul.mubr.msk.bf16.gmra.mrb[4].mxu1 %vm570_vm1, %v3483_v54 }
  0x61   : > { %2731 = vmatprep.mubr.msk.bf16.mxu1 %vm570_vm1, %v750_v10  ;;  %v1664_v10 = vor.u32 %v1663_v50, %v1662_v49  ;;  %v1104_v50 = vrot.slane %v3394_v21, 1  ;;  %v1221_v21 = vrot.slane %v3529_v12, 2 }
  0x63   : > { %2796 = vmatmul.mubr.msk.bf16.gmra.mrb[4].mxu0 %vm570_vm1, %v1452_v15  ;;  %v1666_v15 = vrot.slane %v3552_v30, 2  ;;  %v3616_v44 = vsel %vm1654_vm4, %v1660_v6, %v1664_v10  ;;  %v3634_v63 = vsel %vm997_vm5, %v1103_v47, %v1104_v50  ;;  %v1213_v47 = vrot.slane %v3491_v58, 2 }
  0x64   : > { %2801 = vmatprep.mubr.msk.bf16.mxu0 %vm570_vm1, %v1551_v16  ;;  %v1667_v16 = vrot.slane %v3529_v12, 3 }
  0x66   : > { %v3622_v49 = vor.u32 %v1667_v16, %v1666_v15  ;;  %v1991_v15 = vrot.slane %v3385_v19, 3 }
  0x68   : > { %2732 = vmatmul.mubr.msk.bf16.vlgmr.msra.gmra.mrb[0].mxu1 %vm570_vm1, %v757_v33  ;;  %v3607_v33 = vsel %vm583_vm0, %v3097_v3, 0  ;;  %v3697_v19 = vsel %vm1885_vm6, %v1991_v15, %v1992_v20  ;;  %v2100_v15 = vrot.slane %v3510_v1, 3  ;;  %v3099_v1 = vld [vmem:[%s3945_s2 + $0x60] sm:$0x3f]  }
  0x69   : > { %2735 = vmatprep.mubr.msk.bf16.mxu1 %vm570_vm1, %v764_v51  ;;  %2740 = vmatpush3.bf16.msra.mxu1 %v919_v34  ;;  %v1661_v34 = vsel %vm1654_vm4, %v1657_v5, %v1660_v6  ;;  %v1106_v51 = vrot.slane %v3426_v32, 1  ;;  %v3950_v6 = vrot.slane %v3431_v35, 1 }
  0x6a   : > { %2977 = vmatprep.subr.msk.bf16.mxu1 %vm583_vm0, %v3098_v57  ;;  %v1887_v57 = vrot.slane %v3450_v43, 3 }
  0x6b   : > { %2802 = vmatmul.mubr.msk.bf16.vlgmr.msra.gmra.mrb[0].mxu0 %vm570_vm1, %v1553_v4  ;;  %v998_v4 = vrot.slane %v3444_v39, 1  ;;  %v3641_v5 = vsel %vm997_vm5, %v1104_v50, %v1106_v51  ;;  %v3662_v16 = vsel %vm997_vm5, %v1106_v51, %v3950_v6  ;;  %v1216_v51 = vrot.slane %v3526_v11, 1 }
  0x6c   : > { %2810 = vmatpush3.bf16.msra.mxu0 %v3542_v22  ;;  %2805 = vmatprep.mubr.msk.bf16.mxu0 %vm570_vm1, %v1555_v8  ;;  %v3644_v22 = vsel %vm1885_vm6, %v1886_v55, %v1887_v57  ;;  %v3653_v8 = vsel %vm1654_vm4, %v1664_v10, %v3622_v49  ;;  %v3657_v39 = vsel %vm1885_vm6, %v1887_v57, %v1889_v0  ;;  %v1210_v10 = vrot.slane %v3478_v53, 2 }
  0x6d   : > { %2985 = vmatprep.subr.msk.bf16.mxu0 %vm583_vm0, %v3097_v3  ;;  %v1893_v3 = vrot.slane %v3498_v60, 3  ;;  %v1217_v55 = vrot.slane %v3513_v2, 2  ;;  %v1214_v6 = vor.u32 %v1213_v47, %v1212_v46  ;;  %v2101_v47 = vrot.slane %v3491_v58, 4 }
  0x70   : > { %2736 = vmatmul.mubr.msk.bf16.gmra.mrb[4].mxu1 %vm570_vm1, %v772_v17  ;;  %v1891_v17 = vrot.slane %v3483_v54, 3 }
  0x71   : > { %2741 = vmatprep.mubr.msk.bf16.mxu1 %vm570_vm1, %v878_v28  ;;  %v1209_v28 = vrot.slane %v3487_v56, 1 }
  0x72   : > { %v3672_v48 = vsel %vm1885_vm6, %v1889_v0, %v1891_v17  ;;  %v3675_v50 = vsel %vm1885_vm6, %v1891_v17, %v1893_v3  ;;  %v1771_v0 = vrot.slane %v3407_v24, 3  ;;  %v1218_v17 = vor.u32 %v1217_v55, %v1216_v51 }
  0x73   : > { %3959 = vst [vmem:[#allocation10_spill] sm:$0xff] %v3675_v50  ;;  %v1211_v57 = vor.u32 %v1210_v10, %v1209_v28  ;;  %2806 = vmatmul.mubr.msk.bf16.gmra.mrb[4].mxu0 %vm570_vm1, %v3591_v9  ;;  %v1994_v3 = vrot.slane %v3426_v32, 3  ;;  %v1220_v50 = vrot.slane %v3552_v30, 1  ;;  %v1672_v28 = vor.u32 %v1671_v40, %v1670_v62 }
  0x74   : > { %2811 = vmatprep.mubr.msk.bf16.mxu0 %vm570_vm1, %v1661_v34  ;;  %v3960_v24 = vrot.slane %v3450_v43, 1  ;;  %v3705_v9 = vsel %vm1208_vm2, %v1214_v6, %v1218_v17  ;;  %v1996_v34 = vrot.slane %v3431_v35, 3  ;;  %v1773_v40 = vrot.slane %v3415_v26, 2 }
  0x75   : > { %v3694_v10 = vsel %vm1208_vm2, %v1211_v57, %v1214_v6  ;;  %v3714_v62 = vor.u32 %v1221_v21, %v1220_v50  ;;  %v1338_v50 = vrot.slane %v3575_v59, 2  ;;  %v2104_v51 = vrot.slane %v3526_v11, 3 }
  0x76   : > { %v1000_v32 = vsel %vm997_vm5, %v998_v4, %v3960_v24  ;;  %v1774_v4 = vrot.slane %v3412_v25, 3  ;;  %v3720_v6 = vsel %vm1885_vm6, %v1994_v3, %v1996_v34  ;;  %v2102_v55 = vor.u32 %v2101_v47, %v2100_v15 }
  0x77   : > { %v3726_v26 = vsel %vm1208_vm2, %v1218_v17, %v3714_v62  ;;  %v2105_v57 = vrot.slane %v3513_v2, 4  ;;  %v2108_v17 = vrot.slane %v3552_v30, 3  ;;  %v2112_v21 = vrot.slane %v3613_v42, 3 }
  0x78   : > { %2742 = vmatmul.mubr.msk.bf16.vlgmr.msra.gmra.mrb[0].mxu1 %vm570_vm1, %v885_v29  ;;  %v3708_v29 = vsel %vm1885_vm6, %v1992_v20, %v1994_v3  ;;  %v2098_v20 = vrot.slane %v3478_v53, 4  ;;  %v1772_v53 = vor.u32 %v1771_v0, %v1770_v36  ;;  %v2109_v3 = vrot.slane %v3529_v12, 4 }
  0x79   : > { %2745 = vmatprep.mubr.msk.bf16.mxu1 %vm570_vm1, %v892_v61  ;;  %2750 = vmatpush3.bf16.msra.mxu1 %v1025_v41  ;;  %v1998_v41 = vrot.slane %v3546_v27, 3  ;;  %v2097_v61 = vrot.slane %v3487_v56, 3  ;;  %v1337_v56 = vrot.slane %v3599_v7, 1  ;;  %v2113_v11 = vrot.slane %v3555_v31, 4 }
  0x7a   : > { %2978 = vmatprep.subr.msk.bf16.mxu1 %vm583_vm0, %v3682_v23  ;;  %v1775_v36 = vor.u32 %v1774_v4, %v1773_v40  ;;  %v2106_v30 = vor.u32 %v2105_v57, %v2104_v51  ;;  %v1001_v12 = vrot.slane %v3475_v52, 1  ;;  %v1673_v52 = vsel %vm1654_vm4, %v3622_v49, %v1672_v28 }
  0x7b   : > { %v3729_v46 = vsel %vm1885_vm6, %v1996_v34, %v1998_v41  ;;  %v2099_v25 = vor.u32 %v2098_v20, %v2097_v61  ;;  %2812 = vmatmul.mubr.msk.bf16.vlgmr.msra.gmra.mrb[0].mxu0 %vm570_vm1, %v3616_v44  ;;  %v3742_v58 = vor.u32 %v1338_v50, %v1337_v56  ;;  %v2114_v0 = vor.u32 %v2113_v11, %v2112_v21  ;;  %v3101_v50 = vld [vmem:[%s3945_s2 + $0x68] sm:$0x3f]  }
  0x7c   : > { %2820 = vmatpush3.bf16.msra.mxu0 %v3607_v33  ;;  %2815 = vmatprep.mubr.msk.bf16.mxu0 %vm570_vm1, %v3653_v8  ;;  %v2110_v33 = vor.u32 %v2109_v3, %v2108_v17  ;;  %v3765_v24 = vsel %vm2096_vm7, %v2102_v55, %v2106_v30  ;;  %v1778_v34 = vrot.slane %v3438_v37, 3  ;;  %v3961_v40 = vrot.slane %v3450_v43, 1 }
  0x7d   : > { %v3751_v2 = vsel %vm2096_vm7, %v2099_v25, %v2102_v55  ;;  %v3760_v44 = vsel %vm1208_vm2, %v3454_v45, %v3742_v58  ;;  %2986 = vmatprep.subr.msk.bf16.mxu0 %vm583_vm0, %v3099_v1  ;;  %v1777_v45 = vrot.slane %v3441_v38, 2  ;;  %v1776_v41 = vsel %vm1654_vm4, %v1772_v53, %v1775_v36  ;;  %v3102_v38 = vld [vmem:[%s3945_s2 + $0x30] sm:$0x3f]  }
  0x7e   : > { %v3768_v8 = vsel %vm2096_vm7, %v2106_v30, %v2110_v33  ;;  %v1130_v4 = vsel %vm583_vm0, %v3682_v23, 0  ;;  %v1781_v20 = vrot.slane %v3599_v7, 2  ;;  %v1782_v15 = vrot.slane %v3575_v59, 3 }
  0x7f   : > { %v1779_v37 = vor.u32 %v1778_v34, %v1777_v45  ;;  %v1341_v43 = vshrl.u32 %v3546_v27, 16  ;;  %v1005_v7 = vrot.slane %v3498_v60, 1  ;;  %v1786_v28 = vrot.slane %v3594_v13, 3 }
  0x80   : > { %2746 = vmatmul.mubr.msk.bf16.gmra.mrb[4].mxu1 %vm570_vm1, %v3649_v14  ;;  %v1003_v14 = vrot.slane %v3483_v54, 1  ;;  %v1002_v54 = vsel %vm997_vm5, %v3961_v40, %v1001_v12  ;;  %v1783_v49 = vor.u32 %v1782_v15, %v1781_v20  ;;  %v1913_v47 = vsel %vm583_vm0, %v3099_v1, 0 }
  0x81   : > { %2751 = vmatprep.mubr.msk.bf16.mxu1 %vm570_vm1, %v1000_v32  ;;  %v3771_v32 = vsel %vm2096_vm7, %v2110_v33, %v2114_v0  ;;  %v1780_v59 = vsel %vm1654_vm4, %v1775_v36, %v1779_v37  ;;  %v1785_v23 = vrot.slane %v1341_v43, 2  ;;  %v1248_v53 = vsel %vm583_vm0, %v3102_v38, 0 }
  0x82   : > { %v1004_v61 = vsel %vm997_vm5, %v1001_v12, %v1003_v14  ;;  %v1006_v56 = vsel %vm997_vm5, %v1003_v14, %v1005_v7  ;;  %v1784_v25 = vsel %vm1654_vm4, %v1779_v37, %v1783_v49  ;;  %v2018_v1 = vsel %vm583_vm0, %v3101_v50, 0 }
  0x83   : > { %2816 = vmatmul.mubr.msk.bf16.gmra.mrb[4].mxu0 %vm570_vm1, %v1673_v52  ;;  %v1787_v60 = vor.u32 %v1786_v28, %v1785_v23  ;;  %v3962_v55 = vrot.slane %v3431_v35, 1  ;;  %v1227_v35 = vrot.slane %v3555_v31, 2 }
  0x84   : > { %2821 = vmatprep.mubr.msk.bf16.mxu0 %vm570_vm1, %v1776_v41 }
  0x85   : > { %v1788_v51 = vsel %vm1654_vm4, %v1783_v49, %v1787_v60 }
  0x88   : > { %2752 = vmatmul.mubr.msk.bf16.vlgmr.msra.gmra.mrb[0].mxu1 %vm570_vm1, %v1002_v54 }
  0x89   : > { %2755 = vmatprep.mubr.msk.bf16.mxu1 %vm570_vm1, %v1004_v61  ;;  %2760 = vmatpush3.bf16.msra.mxu1 %v1130_v4 }
  0x8a   : > { %2979 = vmatprep.subr.msk.bf16.mxu1 %vm583_vm0, %v3102_v38 }
  0x8b   : > { %2822 = vmatmul.mubr.msk.bf16.vlgmr.msra.gmra.mrb[0].mxu0 %vm570_vm1, %v1780_v59 }
  0x8c   : > { %2830 = vmatpush3.bf16.msra.mxu0 %v1913_v47  ;;  %2825 = vmatprep.mubr.msk.bf16.mxu0 %vm570_vm1, %v1784_v25 }
  0x8d   : > { %2987 = vmatprep.subr.msk.bf16.mxu0 %vm583_vm0, %v3101_v50 }
  0x90   : > { %2756 = vmatmul.mubr.msk.bf16.gmra.mrb[4].mxu1 %vm570_vm1, %v1006_v56 }
  0x91   : > { %2761 = vmatprep.mubr.msk.bf16.mxu1 %vm570_vm1, %v3634_v63  ;;  %v1110_v63 = vrot.slane %v3546_v27, 1  ;;  %v3963_v27 = vld [vmem:[#allocation10_spill] sm:$0xff] }
  0x93   : > { %2826 = vmatmul.mubr.msk.bf16.gmra.mrb[4].mxu0 %vm570_vm1, %v1788_v51  ;;  %v1111_v57 = vsel %vm997_vm5, %v3962_v55, %v1110_v63 }
  0x94   : > { %2831 = vmatprep.mubr.msk.bf16.mxu0 %vm570_vm1, %v3644_v22  ;;  %v3964_v22 = vld [vmem:[#allocation9_spill] sm:$0xff] }
  0x98   : > { %2762 = vmatmul.mubr.msk.bf16.vlgmr.msra.gmra.mrb[0].mxu1 %vm570_vm1, %v3641_v5  ;;  %v3103_v5 = vld [vmem:[%s3945_s2 + $0x70] sm:$0x3f]  }
  0x99   : > { %2765 = vmatprep.mubr.msk.bf16.mxu1 %vm570_vm1, %v3662_v16  ;;  %2770 = vmatpush3.bf16.msra.mxu1 %v1248_v53  ;;  %v2134_v16 = vsel %vm583_vm0, %v3103_v5, 0 }
  0x9a   : > { %2981 = vmatprep.subr.msk.bf16.mxu1 %vm583_vm0, %v3380_v18  ;;  %v1226_v18 = vrot.slane %v3613_v42, 1  ;;  %v1343_v42 = vrot.slane %v1341_v43, 1 }
  0x9b   : > { %2832 = vmatmul.mubr.msk.bf16.vlgmr.msra.gmra.mrb[0].mxu0 %vm570_vm1, %v3657_v39 }
  0x9c   : > { %2840 = vmatpush3.bf16.msra.mxu0 %v2018_v1  ;;  %2835 = vmatprep.mubr.msk.bf16.mxu0 %vm570_vm1, %v3672_v48  ;;  %v1228_v39 = vor.u32 %v1227_v35, %v1226_v18  ;;  %v1344_v48 = vrot.slane %v3594_v13, 2 }
  0x9d   : > { %2988 = vmatprep.subr.msk.bf16.mxu0 %vm583_vm0, %v3103_v5 }
  0x9e   : > { %v1229_v31 = vsel %vm1208_vm2, %v3714_v62, %v1228_v39 }
  0xa0   : > { %2766 = vmatmul.mubr.msk.bf16.gmra.mrb[4].mxu1 %vm570_vm1, %v1111_v57 }
  0xa1   : > { %2771 = vmatprep.mubr.msk.bf16.mxu1 %vm570_vm1, %v3694_v10  ;;  %v1345_v10 = vor.u32 %v1344_v48, %v1343_v42 }
  0xa3   : > { %2836 = vmatmul.mubr.msk.bf16.gmra.mrb[4].mxu0 %vm570_vm1, %v3963_v27 }
  0xa4   : > { %2841 = vmatprep.mubr.msk.bf16.mxu0 %vm570_vm1, %v3697_v19  ;;  %v1346_v19 = vsel %vm1208_vm2, %v3742_v58, %v1345_v10  ;;  %v2588_v58 = vld [vmem:[%s3946_s3] ss:$0 sm:$0xff] }
  0xa8   : > { %2772 = vmatmul.mubr.msk.bf16.vlgmr.msra.gmra.mrb[0].mxu1 %vm570_vm1, %v3705_v9 }
  0xa9   : > { %2775 = vmatprep.mubr.msk.bf16.mxu1 %vm570_vm1, %v3726_v26  ;;  %2860 = vmatpush3.bf16.msra.mxu1 %v3964_v22 }
  0xab   : > { %2842 = vmatmul.mubr.msk.bf16.vlgmr.msra.gmra.mrb[0].mxu0 %vm570_vm1, %v3708_v29 }
  0xac   : > { %2850 = vmatpush3.bf16.msra.mxu0 %v2134_v16  ;;  %2845 = vmatprep.mubr.msk.bf16.mxu0 %vm570_vm1, %v3720_v6 }
  0xb0   : > { %2776 = vmatmul.mubr.msk.bf16.gmra.mrb[4].mxu1 %vm570_vm1, %v1229_v31 }
  0xb1   : > { %2785 = vmatprep.mubr.msk.bf16.mxu1 %vm570_vm1, %v3760_v44 }
  0xb3   : > { %2846 = vmatmul.mubr.msk.bf16.gmra.mrb[4].mxu0 %vm570_vm1, %v3729_v46 }
  0xb4   : > { %2851 = vmatprep.mubr.msk.bf16.mxu0 %vm570_vm1, %v3751_v2 }
  0xbb   : > { %2852 = vmatmul.mubr.msk.bf16.vlgmr.msra.gmra.mrb[0].mxu0 %vm570_vm1, %v3765_v24 }
  0xbc   : > { %2786 = vmatmul.mubr.msk.bf16.vlgmr.msra.gmra.mrb[4].mxu1 %vm570_vm1, %v1346_v19  ;;  %2855 = vmatprep.mubr.msk.bf16.mxu0 %vm570_vm1, %v3768_v8 }
  0xc3   : > { %2856 = vmatmul.mubr.msk.bf16.gmra.mrb[4].mxu0 %vm570_vm1, %v3771_v32 }
 0x17b   : > { %v2773_v13 = vpop.f32.mrb[0].mxu1 }
 0x17c   : > { %v1284_v9 = vpop.f32.mrb[1].mxu1 }
 0x17d   : > { %v2774_v29 = vpop.f32.mrb[2].mxu1 }
 0x17e   : > { %v1287_v62 = vpop.f32.mrb[3].mxu1 }
 0x18e   : > { %v2853_v17 = vpop.f32.mrb[0].mxu0 }
 0x18f   : > { %v2787_v6 = vpop.f32.mrb[4].mxu1  ;;  %v2861_v21 = vadd.f32 %v2853_v17, %v2773_v13  ;;  %v2170_v11 = vpop.f32.mrb[1].mxu0 }
 0x190   : > { %v1417_v26 = vpop.f32.mrb[5].mxu1  ;;  %v2862_v36 = vadd.f32 %v2170_v11, %v1284_v9  ;;  %v2854_v2 = vpop.f32.mrb[2].mxu0 }
 0x191   : > { %v2788_v46 = vpop.f32.mrb[6].mxu1  ;;  %v2218_v30 = vadd.f32 %v2861_v21, %v2588_v58  ;;  %v2863_v12 = vadd.f32 %v2854_v2, %v2774_v29  ;;  %v2173_v44 = vpop.f32.mrb[3].mxu0 }
 0x192   : > { %v1420_v3 = vpop.f32.mrb[7].mxu1  ;;  %v2216_v33 = vadd.f32 %v2862_v36, %v2588_v58  ;;  %v2864_v0 = vadd.f32 %v2173_v44, %v1287_v62 }
 0x193   : > { %v2234_v14 = vmul.f32 0.01, %v2218_v30  ;;  %v2219_v24 = vadd.f32 %v2863_v12, %v2588_v58  ;;  %vm2226_vm8 = vcmp.ge.f32.partialorder %v2218_v30, 0.0 }
 0x194   : > { %v2232_v8 = vmul.f32 0.01, %v2216_v33  ;;  %v2217_v32 = vadd.f32 %v2864_v0, %v2588_v58  ;;  %vm2224_vm9 = vcmp.ge.f32.partialorder %v2216_v33, 0.0 }
 0x195   : > { %vm2227_vm10 = vcmp.ge.f32.partialorder %v2219_v24, 0.0  ;;  %v2235_v52 = vmul.f32 0.01, %v2219_v24  ;;  %v2242_v40 = vsel %vm2226_vm8, %v2218_v30, %v2234_v14 }
 0x196   : > { %vm2225_vm11 = vcmp.ge.f32.partialorder %v2217_v32, 0.0  ;;  %v2233_v45 = vmul.f32 0.01, %v2217_v32  ;;  %v2857_v34 = vpop.f32.mrb[4].mxu0  ;;  %v2240_v4 = vsel %vm2224_vm9, %v2216_v33, %v2232_v8 }
 0x197   : > { %v2243_v54 = vsel %vm2227_vm10, %v2219_v24, %v2235_v52  ;;  %v2865_v41 = vadd.f32 %v2857_v34, %v2787_v6  ;;  %v2186_v61 = vpop.f32.mrb[5].mxu0 }
 0x198   : > { %v2619_v20 = vpack.c.bf16 %v2243_v54, %v2242_v40  ;;  %v2241_v15 = vsel %vm2225_vm11, %v2217_v32, %v2233_v45  ;;  %v2866_v38 = vadd.f32 %v2186_v61, %v1417_v26  ;;  %v2858_v37 = vpop.f32.mrb[6].mxu0 }
 0x199   : > { %v2614_v43 = vpack.c.bf16 %v2241_v15, %v2240_v4  ;;  %v2222_v7 = vadd.f32 %v2865_v41, %v2588_v58  ;;  %v2867_v49 = vadd.f32 %v2858_v37, %v2788_v46  ;;  %v2189_v59 = vpop.f32.mrb[7].mxu0 }
 0x19a   : > { %2631 = vst [vmem:[%s477_s29 + $0x8] sm:$0xff] %v2619_v20   ;;  %v2220_v23 = vadd.f32 %v2866_v38, %v2588_v58  ;;  %v2868_v28 = vadd.f32 %v2189_v59, %v1420_v3 }
 0x19b   : > { %2615 = vst [vmem:[%s477_s29] sm:$0xff] %v2614_v43   ;;  %v2238_v47 = vmul.f32 0.01, %v2222_v7  ;;  %v2223_v56 = vadd.f32 %v2867_v49, %v2588_v58  ;;  %vm2230_vm12 = vcmp.ge.f32.partialorder %v2222_v7, 0.0 }
 0x19c   : > { %v2236_v25 = vmul.f32 0.01, %v2220_v23  ;;  %v2221_v50 = vadd.f32 %v2868_v28, %v2588_v58  ;;  %vm2228_vm13 = vcmp.ge.f32.partialorder %v2220_v23, 0.0 }
 0x19d   : > { %vm2231_vm14 = vcmp.ge.f32.partialorder %v2223_v56, 0.0  ;;  %v2239_v60 = vmul.f32 0.01, %v2223_v56  ;;  %v2246_v53 = vsel %vm2230_vm12, %v2222_v7, %v2238_v47 }
 0x19e   : > { %vm2229_vm15 = vcmp.ge.f32.partialorder %v2221_v50, 0.0  ;;  %v2237_v51 = vmul.f32 0.01, %v2221_v50  ;;  %v2244_v1 = vsel %vm2228_vm13, %v2220_v23, %v2236_v25 }
 0x19f   : > { %v2247_v63 = vsel %vm2231_vm14, %v2223_v56, %v2239_v60 }
 0x1a0   : > { %v2629_v55 = vpack.c.bf16 %v2247_v63, %v2246_v53  ;;  %v2245_v57 = vsel %vm2229_vm15, %v2221_v50, %v2237_v51 }
 0x1a1   : > { %v2624_v5 = vpack.c.bf16 %v2245_v57, %v2244_v1 }
 0x1a2   : > { %2633 = vst [vmem:[%s477_s29 + $0x18] sm:$0xff] %v2629_v55  }
 0x1a3   : > { %2632 = vst [vmem:[%s477_s29 + $0x10] sm:$0xff] %v2624_v5  }
 0x1a4   : > { %3117 = shalt.err (!%p3114_p10)
}
 0x1a5   : > { %s3118_s5 = scalar_lea.hbm %s3881_s26, 512  ;;  %s3122_s10 = scalar_lea.hbm %s3947_s4, 2048 }
 0x1a6   : > { %p3119_p12 = scmp.ne.s32.totalorder %s3881_s26, %s3118_s5  ;;  %p3123_p2 = scmp.lt.u32.totalorder %s3881_s26, %s3947_s4 }
 0x1a7   : > { %p3124_p3 = scmp.lt.u32.totalorder %s3122_s10, %s3118_s5  ;;  %p3126_p5 = scmp.lt.u32.totalorder %s3118_s5, %s3881_s26 }
 0x1a8   : > { %p3120_p0 = pnand %p3119_p12, %p3335_p11 }
 0x1a9   : > { %p3125_p4 = por %p3124_p3, %p3123_p2 }
 0x1aa   : > { %p3121_p1 = pneg %p3120_p0 }
 0x1ab   : > { %p3127_p6 = por %p3126_p5, %p3125_p4 }
 0x1ad   : > { %p3128_p7 = pnand %p3127_p6, %p3121_p1 }
 0x1af   : > { %3131 = shalt.err (!%p3128_p7)
}
 0x1b0   : > { %s3217_s11 = smov 64   ;;  %s3218_s12 = smov 4  }
 0x1b1   : > { %2990 = dma.vmem_to_hbm [thread:$0]  (%p3335_p11), %s3883_s21, 512, %s3881_s26, %s2289_s16, %s3217_s11, %s3217_s11, %s3218_s12  }
 0x1b2 PF: > { %p2996_p8 = scmp.ge.s32.totalorder %s3214_s24, 2  ;;  %s2320_s28 = sand.u32 1, %s3178_s15  }
 0x1b3   : > { %s2321_s30 = scalar_lea.sflag [#allocation5], %s2320_s28 }
 0x1b4   : > { %p2993_p9 = pnand %p2996_p8, %p3345_p13 }
 0x1b6   : > { %3173 = dma.done.wait (!%p2993_p9), %s2321_s30, 512  }
 0x1b7   : > { %3175 = vsyncadd (!%p2993_p9), %s2321_s30, 4294966784  ;;  %s17_s24 = sadd.s32 1, %s3214_s24   ;;  %s3965_s14 = sld [smem:[#allocation7_spill]] }
 0x1b8   : > { %p14_p10 = scmp.ge.s32.totalorder %s17_s24, 6   ;;  %s3966_s6 = sld [smem:[#allocation8_spill]] }
 0x1b9   : > { %s3967_s15 = smov %s3190_s18  ;;  %s3968_s16 = smov %s3186_s17 }
 0x1ba   : > { %s3969_s17 = smov %s3343_s7  ;;  %s3970_s18 = smov %s3194_s19 }
 0x1bb   : > { %s3971_s19 = smov %s3340_s27  ;;  %s3972_s20 = smov %s3206_s22 }
 0x1bc   : > { %s3973_s21 = smov %s3210_s23  ;;  %16 = sbr.rel (!%p14_p10) target bundleno = 6 (0x6), region = 186 }
 0x1bd   : > { %s3974_s22 = smov %s3965_s14 }
 0x1be   : > { %s3975_s23 = smov %s3966_s6 }
 0x1c3   :  { %2326 = vsyncpa [#allocation5], 1 }
 0x1c4   :  { %2328 = vsyncpa [#allocation5 + $0x1], 1 }

</bundles_post_ra>
